<compile_context>
chip_gen: v7x
topology: tpu7x:2x2x1
jax: 0.10.0
libtpu: 0.0.40
codegen_flags: <defaults>
</compile_context>

<pallas_src>
import jax
import jax.numpy as jnp
from jax.experimental import pallas as pl
from jax.experimental.pallas import tpu as pltpu


def _clamped_vmem(nbytes, lo=32 << 20, hi=64 << 20):
    """Clamp a VMEM-limit estimate to a safe range for v5e/v6e/v7x."""
    return int(min(max(nbytes, lo), hi))


def _choose_hidden_tile(hidden_dim, intermediate, num_tokens, itemsize,
                        budget_bytes=48 << 20):
    """Largest 128-multiple divisor of hidden_dim whose streamed buffers fit VMEM."""
    assert hidden_dim % 128 == 0
    candidates = [d for d in range(hidden_dim, 0, -128) if hidden_dim % d == 0]
    resident = num_tokens * intermediate * itemsize          # h, VMEM-resident
    for tn in candidates:
        streamed = 2 * (intermediate * tn + tn + num_tokens * tn) * itemsize
        if resident + streamed + (2 << 20) <= budget_bytes:
            return tn
    return 128


# --------------------------- kernel 1: h = tanh(p @ W1 + b1) -----------------

def _f1_kernel(p_ref, w1_ref, b1_ref, h_ref):
    """p:[nt,hd] w1:[hd,inter] b1:[1,inter] -> h:[nt,inter]."""
    h = jnp.dot(p_ref[...], w1_ref[...], preferred_element_type=jnp.float32)
    h = h + b1_ref[...].astype(jnp.float32)
    h_ref[...] = jnp.tanh(h).astype(h_ref.dtype)   # match PyTorch: bf16 h before f2


def _compute_h(params, w1, b1):
    num_tokens, hidden_dim = params.shape
    intermediate = w1.shape[1]
    itemsize = jnp.dtype(params.dtype).itemsize
    need = (num_tokens * hidden_dim + hidden_dim * intermediate
            + intermediate + num_tokens * intermediate) * itemsize + (2 << 20)
    cost = pl.CostEstimate(
        flops=2 * num_tokens * hidden_dim * intermediate,
        transcendentals=num_tokens * intermediate,
        bytes_accessed=need - (2 << 20))
    return pl.pallas_call(
        _f1_kernel,
        out_shape=jax.ShapeDtypeStruct((num_tokens, intermediate), params.dtype),
        in_specs=[pl.BlockSpec(memory_space=pltpu.MemorySpace.VMEM)] * 3,
        out_specs=pl.BlockSpec(memory_space=pltpu.MemorySpace.VMEM),
        compiler_params=pltpu.CompilerParams(vmem_limit_bytes=_clamped_vmem(need)),
        cost_estimate=cost,
    )(params, w1, b1)


# ---------------- kernel 2: per-(layer, tile) out = h @ W2_tile + b2_tile ----

def _f2_kernel(h_ref, w2_ref, b2_ref, out_ref):
    """h:[nt,inter] w2:[inter,tn] b2:[1,tn] -> out block [1,nt,tn]."""
    o = jnp.dot(h_ref[...], w2_ref[...], preferred_element_type=jnp.float32)
    o = o + b2_ref[...].astype(jnp.float32)        # fold bias in f32, single cast
    out_ref[0] = o.astype(out_ref.dtype)


def _f2_gated_kernel(gates_ref, h_ref, w2_ref, b2_ref, out_ref):
    """Same as _f2_kernel but multiplies by the per-layer gate scalar (SMEM)."""
    g = gates_ref[pl.program_id(0)]                # scalar read from prefetched SMEM
    o = jnp.dot(h_ref[...], w2_ref[...], preferred_element_type=jnp.float32)
    o = (o + b2_ref[...].astype(jnp.float32)) * g
    out_ref[0] = o.astype(out_ref.dtype)


def _per_layer_outputs(h, w2, b2, num_layers, hidden_dim, gates=None):
    """Streams W2 layer-by-layer; returns [num_layers, num_tokens, hidden_dim]."""
    num_tokens, intermediate = h.shape
    dtype = h.dtype
    itemsize = jnp.dtype(dtype).itemsize

    tn = _choose_hidden_tile(hidden_dim, intermediate, num_tokens, itemsize)
    n_j = hidden_dim // tn
    out_shape = jax.ShapeDtypeStruct((num_layers, num_tokens, hidden_dim), dtype)

    resident = num_tokens * intermediate * itemsize
    streamed = 2 * (intermediate * tn + tn + num_tokens * tn) * itemsize
    vmem_limit = _clamped_vmem(resident + streamed + (4 << 20))

    cost = pl.CostEstimate(
        flops=2 * num_tokens * intermediate * num_layers * hidden_dim,
        transcendentals=0,
        bytes_accessed=(num_tokens * intermediate
                        + intermediate * num_layers * hidden_dim
                        + num_layers * hidden_dim
                        + num_layers * num_tokens * hidden_dim) * itemsize)

    if gates is None:
        grid_spec = pltpu.PrefetchScalarGridSpec(
            num_scalar_prefetch=0,
            grid=(num_layers, n_j),
            in_specs=[
                # h stays resident: constant block index -> fetched once
                pl.BlockSpec((num_tokens, intermediate), lambda l, j: (0, 0)),
                # layer-aligned W2 / b2 tiles streamed with double buffering
                pl.BlockSpec((intermediate, tn), lambda l, j: (0, l * n_j + j)),
                pl.BlockSpec((1, tn), lambda l, j: (0, l * n_j + j)),
            ],
            out_specs=pl.BlockSpec((1, num_tokens, tn), lambda l, j: (l, 0, j)),
        )
        kernel = _f2_kernel
        operands = (h, w2, b2)
    else:
        grid_spec = pltpu.PrefetchScalarGridSpec(
            num_scalar_prefetch=1,          # gates -> SMEM scalars
            grid=(num_layers, n_j),
            in_specs=[
                pl.BlockSpec((num_tokens, intermediate), lambda l, j, g: (0, 0)),
                pl.BlockSpec((intermediate, tn), lambda l, j, g: (0, l * n_j + j)),
                pl.BlockSpec((1, tn), lambda l, j, g: (0, l * n_j + j)),
            ],
            out_specs=pl.BlockSpec((1, num_tokens, tn), lambda l, j, g: (l, 0, j)),
        )
        kernel = _f2_gated_kernel
        operands = (gates.astype(jnp.float32), h, w2, b2)

    return pl.pallas_call(
        kernel,
        out_shape=out_shape,
        grid_spec=grid_spec,
        compiler_params=pltpu.CompilerParams(
            # every (layer, tile) block is independent -> shard across TCs (v7x)
            dimension_semantics=("parallel", "parallel"),
            vmem_limit_bytes=vmem_limit,
        ),
        cost_estimate=cost,
    )(*operands)


# ---------------- fallback: full f2 in one block (non-128-aligned hidden) ----

def _f2_full_kernel(h_ref, w2_ref, b2_ref, out_ref):
    o = jnp.dot(h_ref[...], w2_ref[...], preferred_element_type=jnp.float32)
    out_ref[...] = (o + b2_ref[...].astype(jnp.float32)).astype(out_ref.dtype)


def _f2_full(h, w2, b2):
    num_tokens, intermediate = h.shape
    out_dim = w2.shape[1]
    itemsize = jnp.dtype(h.dtype).itemsize
    need = (num_tokens * intermediate + intermediate * out_dim + out_dim
            + num_tokens * out_dim) * itemsize + (2 << 20)
    return pl.pallas_call(
        _f2_full_kernel,
        out_shape=jax.ShapeDtypeStruct((num_tokens, out_dim), h.dtype),
        in_specs=[pl.BlockSpec(memory_space=pltpu.MemorySpace.VMEM)] * 3,
        out_specs=pl.BlockSpec(memory_space=pltpu.MemorySpace.VMEM),
        compiler_params=pltpu.CompilerParams(vmem_limit_bytes=_clamped_vmem(need)),
    )(h, w2, b2)


# ------------------------------------ wrapper --------------------------------

class HiddenStateMLPWrapperPallas:
    """JAX/Pallas port of HiddenStateMLPWrapper with deterministic init."""

    def __init__(self, num_tokens, num_layers, num_heads, head_dim,
                 include_gates=False, apply_internal_gates=False,
                 intermediate_size=1024, dtype=jnp.bfloat16, seed=0):
        self.num_tokens = num_tokens
        self.num_layers = num_layers
        self.num_heads = num_heads
        self.head_dim = head_dim
        self.hidden_dim = num_heads * head_dim
        self.include_gates = include_gates
        self.apply_internal_gates = apply_internal_gates
        self.intermediate_size = intermediate_size
        self.dtype = dtype

        key = jax.random.PRNGKey(seed)
        k_p, k_w1, k_b1, k_w2, k_b2 = jax.random.split(key, 5)

        hd = self.hidden_dim
        # torch.nn.init.normal_(self.params)
        self.params = jax.random.normal(k_p, (num_tokens, hd), jnp.float32).astype(dtype)
        # nn.Linear default init U(-1/sqrt(fan_in), 1/sqrt(fan_in)); stored [in, out]
        bound1 = 1.0 / (hd ** 0.5)
        self.w1 = jax.random.uniform(k_w1, (hd, intermediate_size), jnp.float32,
                                     -bound1, bound1).astype(dtype)
        self.b1 = jax.random.uniform(k_b1, (1, intermediate_size), jnp.float32,
                                     -bound1, bound1).astype(dtype)
        bound2 = 1.0 / (intermediate_size ** 0.5)
        self.w2 = jax.random.uniform(k_w2, (intermediate_size, num_layers * hd), jnp.float32,
                                     -bound2, bound2).astype(dtype)
        self.b2 = jax.random.uniform(k_b2, (1, num_layers * hd), jnp.float32,
                                     -bound2, bound2).astype(dtype)
        if include_gates:
            # torch.nn.init.zeros_(self.gates)
            self.gates = jnp.zeros((num_layers,), dtype=dtype)
        else:
            self.gates = None

    def forward(self, batch_size):
        nl, nt, hd = self.num_layers, self.num_tokens, self.hidden_dim

        # f1 + tanh once (tiny), then stream f2 over (layer, hidden-tile),
        # producing [num_layers, num_tokens, hidden_dim] directly.
        h = _compute_h(self.params, self.w1, self.b1)
        internal_gates = (self.gates
                          if (self.include_gates and self.apply_internal_gates) else None)

        if hd % 128 == 0:
            per_layer = _per_layer_outputs(h, self.w2, self.b2, nl, hd,
                                           gates=internal_gates)
        else:
            # TODO(synk): non-128-aligned hidden dims use a single full-block f2
            # kernel + XLA reshape/permute instead of the streamed layout.
            out = _f2_full(h, self.w2, self.b2)
            per_layer = out.reshape(nt, nl, hd).transpose(1, 0, 2)
            if internal_gates is not None:
                per_layer = per_layer * internal_gates.astype(per_layer.dtype)[:, None, None]

        prefixes = []
        for layer_i in range(nl):
            hs = jnp.broadcast_to(per_layer[layer_i][None], (batch_size, nt, hd))
            layer_prefix = {"hidden_states": hs}
            if self.include_gates and not self.apply_internal_gates:
                layer_prefix["gate"] = self.gates[layer_i]
            prefixes.append(layer_prefix)
        return prefixes


if __name__ == "__main__":
    # Small but TPU-friendly shapes: bf16 min tile is (16, 128), so num_tokens=16
    # and hidden_dim / intermediate multiples of 128 give unmasked vregs/stores.
    num_tokens = 16
    num_layers = 2
    num_heads = 4
    head_dim = 32            # hidden_dim = 128
    intermediate_size = 256
    batch_size = 2

    # Path 1: gates returned alongside hidden_states (non-gated streaming kernel).
    module = HiddenStateMLPWrapperPallas(
        num_tokens=num_tokens, num_layers=num_layers,
        num_heads=num_heads, head_dim=head_dim,
        include_gates=True, apply_internal_gates=False,
        intermediate_size=intermediate_size, dtype=jnp.bfloat16, seed=0)
    prefixes = module.forward(batch_size)
    for p in prefixes:
        jax.block_until_ready(p["hidden_states"])

    # Pure-JAX reference of the same math.
    hd = num_heads * head_dim
    ref_h = jnp.tanh(
        jnp.dot(module.params.astype(jnp.float32), module.w1.astype(jnp.float32))
        + module.b1.astype(jnp.float32)).astype(jnp.bfloat16)
    ref_out = (jnp.dot(ref_h.astype(jnp.float32), module.w2.astype(jnp.float32))
               + module.b2.astype(jnp.float32)).astype(jnp.bfloat16)
    ref_layers = ref_out.reshape(num_tokens, num_layers, hd).transpose(1, 0, 2)
    for layer_i in range(num_layers):
        got = prefixes[layer_i]["hidden_states"][0].astype(jnp.float32)
        ref = ref_layers[layer_i].astype(jnp.float32)
        err = float(jnp.max(jnp.abs(got - ref)))
        assert err < 5e-2, f"layer {layer_i} mismatch vs reference: {err}"
        assert "gate" in prefixes[layer_i]
        assert prefixes[layer_i]["hidden_states"].shape == (batch_size, num_tokens, hd)

    # Path 2: apply_internal_gates=True.  Override the zero init with nonzero
    # gates to actually exercise the gated kernel's multiply.
    module_g = HiddenStateMLPWrapperPallas(
        num_tokens=num_tokens, num_layers=num_layers,
        num_heads=num_heads, head_dim=head_dim,
        include_gates=True, apply_internal_gates=True,
        intermediate_size=intermediate_size, dtype=jnp.bfloat16, seed=0)
    module_g.gates = jnp.array([0.5, -1.25], dtype=jnp.bfloat16)
    prefixes_g = module_g.forward(batch_size)
    for layer_i, p in enumerate(prefixes_g):
        hs = jax.block_until_ready(p["hidden_states"])[0].astype(jnp.float32)
        g = float(module_g.gates[layer_i])
        ref = ref_layers[layer_i].astype(jnp.float32) * g
        err = float(jnp.max(jnp.abs(hs - ref)))
        assert err < 7e-2, f"gated layer {layer_i} mismatch vs reference: {err}"
        assert "gate" not in p

    # Default zero-init gates => zero output (matches PyTorch module).
    module_z = HiddenStateMLPWrapperPallas(
        num_tokens=num_tokens, num_layers=num_layers,
        num_heads=num_heads, head_dim=head_dim,
        include_gates=True, apply_internal_gates=True,
        intermediate_size=intermediate_size, dtype=jnp.bfloat16, seed=0)
    for p in module_z.forward(batch_size):
        hs = jax.block_until_ready(p["hidden_states"])
        assert float(jnp.max(jnp.abs(hs.astype(jnp.float32)))) == 0.0

    print("KERNEL_OK")
</pallas_src>

<mosaic_0001>
module attributes {stable_mosaic.version = 11 : i64} {
  func.func @_f1_kernel(%arg0: memref<16x128xbf16, #tpu.memory_space<vmem>>, %arg1: memref<128x256xbf16, #tpu.memory_space<vmem>>, %arg2: memref<1x256xbf16, #tpu.memory_space<vmem>>, %arg3: memref<16x256xbf16, #tpu.memory_space<vmem>>) attributes {dimension_semantics = [], scalar_prefetch = 0 : i64, scratch_operands = 0 : i64, tpu.core_type = #tpu.core_type<tc>} {
    %c0 = arith.constant 0 : index
    %c0_0 = arith.constant 0 : index
    %0 = vector.load %arg0[%c0, %c0_0] : memref<16x128xbf16, #tpu.memory_space<vmem>>, vector<16x128xbf16>
    %c0_1 = arith.constant 0 : index
    %c0_2 = arith.constant 0 : index
    %1 = vector.load %arg1[%c0_1, %c0_2] : memref<128x256xbf16, #tpu.memory_space<vmem>>, vector<128x256xbf16>
    %cst = arith.constant dense<0.000000e+00> : vector<16x256xf32>
    %2 = tpu.matmul %0, %1, %cst {dimension_numbers = #tpu.dot_dimension_numbers<[1], [0], [0], [1], [0, 0, 1, 1], [], []>} : vector<16x128xbf16>, vector<128x256xbf16>, vector<16x256xf32> -> vector<16x256xf32>
    %c0_3 = arith.constant 0 : index
    %c0_4 = arith.constant 0 : index
    %3 = vector.load %arg2[%c0_3, %c0_4] : memref<1x256xbf16, #tpu.memory_space<vmem>>, vector<1x256xbf16>
    %4 = arith.extf %3 : vector<1x256xbf16> to vector<1x256xf32>
    %5 = vector.broadcast %4 : vector<1x256xf32> to vector<16x256xf32>
    %6 = arith.addf %2, %5 : vector<16x256xf32>
    %7 = math.tanh %6 : vector<16x256xf32>
    %8 = arith.truncf %7 : vector<16x256xf32> to vector<16x256xbf16>
    %c0_5 = arith.constant 0 : index
    %c0_6 = arith.constant 0 : index
    %9 = vector.load %arg3[%c0_5, %c0_6] : memref<16x256xbf16, #tpu.memory_space<vmem>>, vector<16x256xbf16>
    tpu.vector_store %arg3[%c0_5, %c0_6], %8 {strides = array<i32>} : memref<16x256xbf16, #tpu.memory_space<vmem>>, vector<16x256xbf16>,
    return
  }
}

</mosaic_0001>

<bundles_post_ra>
// kernel: tpu_custom_call.1
= control target key start
LH: loop header
LB: loop body
LE: loop exit
PB: predicated region body
PF: predicated region fallthrough
CT: control target
= control target key end

     0   :  { %8 = vsyncpa [#allocation3], 0  ;;  %s455_s0 = inlined_call_operand.hbm [shape: bf16[16,128], index: 0, kind: input, shape index: {}]   ;;  %s456_s1 = inlined_call_operand.hbm [shape: bf16[128,256], index: 1, kind: input, shape index: {}]   ;;  %s457_s2 = inlined_call_operand.vmem [shape: bf16[1,256], index: 2, kind: input, shape index: {}]   ;;  %s458_s3 = inlined_call_operand.hbm [shape: bf16[16,256], index: 3, kind: output, shape index: {}]  }
   0x1   :  { %9 = vsyncpa [#allocation6], 0 }
   0x2   :  { %10 = vsyncpa [#allocation4], 0  ;;  %s382_s12 = smov [#allocation2]   ;;  %s310_s16 = scalar_lea.hbm %s455_s0, 128 }
   0x3   :  { %s16_s13 = sshll.u32 %s382_s12, 4  ;;  %p311_p0 = scmp.ne.s32.totalorder %s455_s0, %s310_s16  ;;  %s17_s13 = int_to_ptr.vmem [resolvable:$true] %s16_s13 }
   0x4   :  { %p314_p1 = scmp.lt.u32.totalorder %s310_s16, %s455_s0 }
   0x6   :  { %p316_p2 = pnand %p314_p1, %p311_p0 }
   0x8   :  { %319 = shalt.err (!%p316_p2)
}
   0x9   :  { %s320_s21 = scalar_lea.vmem %s17_s13, 128  ;;  %p325_p4 = scmp.lt.s32.totalorder %s17_s13, %s17_s13 }
   0xa   :  { %p321_p3 = scmp.ne.s32.totalorder %s17_s13, %s320_s21  ;;  %p326_p5 = scmp.lt.s32.totalorder %s320_s21, %s320_s21 }
   0xc   :  { %p327_p6 = por %p326_p5, %p325_p4 }
   0xe   :  { %p328_p7 = pnand %p327_p6, %p321_p3 }
  0x10   :  { %331 = shalt.err (!%p328_p7)
}
  0x11   :  { %s383_s22 = smov 64   ;;  %s384_s23 = smov 4  }
  0x12   :  { %22 = dma.hbm_to_vmem [thread:$0]  %s455_s0, 128, %s17_s13, [#allocation3], %s383_s22, %s383_s22, %s384_s23  }
  0x13   :  { %s385_s26 = smov [#allocation5]   ;;  %s332_s30 = scalar_lea.hbm %s456_s1, 2048 }
  0x14   :  { %s28_s27 = sshll.u32 %s385_s26, 4  ;;  %p333_p8 = scmp.ne.s32.totalorder %s456_s1, %s332_s30  ;;  %s29_s27 = int_to_ptr.vmem [resolvable:$true] %s28_s27 }
  0x15   :  { %p336_p9 = scmp.lt.u32.totalorder %s332_s30, %s456_s1 }
  0x17   :  { %p338_p10 = pnand %p336_p9, %p333_p8 }
  0x19   :  { %341 = shalt.err (!%p338_p10)
}
  0x1a   :  { %s342_s8 = scalar_lea.vmem %s29_s27, 2048  ;;  %p347_p12 = scmp.lt.s32.totalorder %s29_s27, %s29_s27 }
  0x1b   :  { %p343_p11 = scmp.ne.s32.totalorder %s29_s27, %s342_s8  ;;  %p348_p13 = scmp.lt.s32.totalorder %s342_s8, %s342_s8 }
  0x1d   :  { %p349_p0 = por %p348_p13, %p347_p12 }
  0x1f   :  { %p350_p1 = pnand %p349_p0, %p343_p11 }
  0x21   :  { %353 = shalt.err (!%p350_p1)
}
  0x22   :  { %s386_s0 = smov 128   ;;  %s387_s9 = smov 8  }
  0x23   :  { %34 = dma.hbm_to_vmem [thread:$0]  %s456_s1, 2048, %s29_s27, [#allocation6], %s386_s0, %s386_s0, %s387_s9  }
  0x24   :  { %376 = dma.done.wait [#allocation3], 128  }
  0x25   :  { %377 = vsyncadd [#allocation3], 4294967168 }
  0x26   :  { %378 = dma.done.wait [#allocation6], 2048  }
  0x27   :  { %379 = vsyncadd [#allocation6], 4294965248  ;;  %v388_v0 = vmov 0   ;;  %v277_v1 = vld [vmem:[#allocation5 + $0x4] ss:$8 sps:$4 sm:$0xff]   ;;  %v301_v17 = vld [vmem:[#allocation2] sm:$0xff]   ;;  %v65_v18 = vlaneseq }
  0x28   :  { %201 = vmatprep.mubr.bf16.mxu0 %v388_v0  ;;  %v279_v2 = vld [vmem:[#allocation5] ss:$8 sps:$4 sm:$0xff]   ;;  %169 = vmatprep.subr.bf16.mxu0 %v277_v1  ;;  %v280_v3 = vld [vmem:[#allocation5 + $0x14] ss:$8 sps:$4 sm:$0xff]   ;;  %v282_v4 = vld [vmem:[#allocation5 + $0x10] ss:$8 sps:$4 sm:$0xff]  }
  0x29   :  { %170 = vmatpush1.bf16.msra.mxu0 %v279_v2  ;;  %v283_v5 = vld [vmem:[#allocation5 + $0x24] ss:$8 sps:$4 sm:$0xff]   ;;  %v285_v6 = vld [vmem:[#allocation5 + $0x20] ss:$8 sps:$4 sm:$0xff]   ;;  %v286_v7 = vld [vmem:[#allocation5 + $0x34] ss:$8 sps:$4 sm:$0xff]  }
  0x2a   :  { %171 = vmatprep.subr.bf16.mxu0 %v280_v3  ;;  %v288_v8 = vld [vmem:[#allocation5 + $0x30] ss:$8 sps:$4 sm:$0xff]   ;;  %v289_v9 = vld [vmem:[#allocation5 + $0x44] ss:$8 sps:$4 sm:$0xff]   ;;  %v291_v10 = vld [vmem:[#allocation5 + $0x40] ss:$8 sps:$4 sm:$0xff]  }
  0x2b   :  { %v292_v11 = vld [vmem:[#allocation5 + $0x54] ss:$8 sps:$4 sm:$0xff]   ;;  %v294_v12 = vld [vmem:[#allocation5 + $0x50] ss:$8 sps:$4 sm:$0xff]   ;;  %v295_v13 = vld [vmem:[#allocation5 + $0x64] ss:$8 sps:$4 sm:$0xff]  }
  0x2c   :  { %v297_v14 = vld [vmem:[#allocation5 + $0x60] ss:$8 sps:$4 sm:$0xff]   ;;  %v298_v15 = vld [vmem:[#allocation5 + $0x74] ss:$8 sps:$4 sm:$0xff]   ;;  %v300_v16 = vld [vmem:[#allocation5 + $0x70] ss:$8 sps:$4 sm:$0xff]  }
  0x2d   :  { %172 = vmatpush1.bf16.msra.mxu0 %v282_v4  ;;  %v66_v19 = vshrl.u32 %v65_v18, 7  ;;  %v62_v20 = vld [vmem:[%s457_s2] sm:$0x3]  ;;  %s389_s2 = smov [#allocation7]  }
  0x2e   :  { %173 = vmatprep.subr.bf16.mxu0 %v283_v5  ;;  %v63_v21 = vunpack.c.l.bf16 %v62_v20  ;;  %s235_s13 = sshll.u32 %s389_s2, 4  ;;  %s236_s13 = int_to_ptr.vmem [resolvable:$true] %s235_s13 }
  0x2f   :  { %v67_v22 = vsub.s32 0, %v66_v19  ;;  %v71_v23 = vsub.s32 2, %v66_v19  ;;  %s354_s14 = scalar_lea.vmem %s236_s13, 256  ;;  %p359_p3 = scmp.lt.s32.totalorder %s236_s13, %s236_s13 }
  0x30   :  { %p355_p2 = scmp.ne.s32.totalorder %s236_s13, %s354_s14  ;;  %p360_p4 = scmp.lt.s32.totalorder %s354_s14, %s354_s14 }
  0x31   :  { %174 = vmatpush1.bf16.msra.mxu0 %v285_v6  ;;  %v68_v24 = vrot.slane %v63_v21, %v67_v22  ;;  %v72_v25 = vrot.slane %v63_v21, %v71_v23 }
  0x32   :  { %175 = vmatprep.subr.bf16.mxu0 %v286_v7  ;;  %p361_p5 = por %p360_p4, %p359_p3 }
  0x33   :  { %v78_v26 = vrot.slane %v68_v24, %v67_v22  ;;  %v82_v27 = vrot.slane %v72_v25, %v67_v22 }
  0x34   :  { %p362_p6 = pnand %p361_p5, %p355_p2 }
  0x35   :  { %176 = vmatpush1.bf16.msra.mxu0 %v288_v8 }
  0x36   :  { %177 = vmatprep.subr.bf16.mxu0 %v289_v9 }
  0x39   :  { %178 = vmatpush1.bf16.msra.mxu0 %v291_v10 }
  0x3a   :  { %179 = vmatprep.subr.bf16.mxu0 %v292_v11 }
  0x3d   :  { %180 = vmatpush1.bf16.msra.mxu0 %v294_v12 }
  0x3e   :  { %181 = vmatprep.subr.bf16.mxu0 %v295_v13 }
  0x41   :  { %182 = vmatpush1.bf16.msra.mxu0 %v297_v14 }
  0x42   :  { %183 = vmatprep.subr.bf16.mxu0 %v298_v15 }
  0x45   :  { %184 = vmatpush1.bf16.msra.mxu0 %v300_v16 }
  0x48   :  { %202 = vmatmul.mubr.bf16.vlgmr.msra.gmra.mrb[0].mxu0 %v301_v17 }
 0x11b   :  { %v203_v28 = vpop.f32.mrb[0].mxu0 }
 0x11c   :  { %v204_v29 = vadd.f32 %v203_v28, %v78_v26  ;;  %v205_v30 = vpop.f32.mrb[1].mxu0 }
 0x11d   :  { %v206_v31 = vadd.f32 %v205_v30, %v82_v27  ;;  %v207_v32 = vpop.f32.mrb[2].mxu0 }
 0x11e   :  { %302 = vtanh.f32 %v204_v29  ;;  %v208_v33 = vadd.f32 %v207_v32, %v78_v26  ;;  %v209_v34 = vpop.f32.mrb[3].mxu0 }
 0x11f   :  { %304 = vtanh.f32 %v206_v31  ;;  %v210_v35 = vadd.f32 %v209_v34, %v82_v27 }
 0x120   :  { %306 = vtanh.f32 %v208_v33 }
 0x121   :  { %308 = vtanh.f32 %v210_v35 }
 0x128   :  { %v303_v36 = vpop.eup %302 }
 0x129   :  { %v305_v37 = vpop.eup %304 }
 0x12a   :  { %v307_v38 = vpop.eup %306  ;;  %v267_v39 = vpack.c.bf16 %v305_v37, %v303_v36 }
 0x12b   :  { %v309_v40 = vpop.eup %308 }
 0x12c   :  { %v268_v41 = vpack.c.bf16 %v309_v40, %v307_v38  ;;  %228 = vst [vmem:[#allocation7] sm:$0xff] %v267_v39 }
 0x12e   :  { %229 = vst [vmem:[#allocation7 + $0x8] sm:$0xff] %v268_v41 }
 0x12f   :  { %365 = shalt.err (!%p362_p6)
}
 0x130   :  { %s366_s17 = scalar_lea.hbm %s458_s3, 256 }
 0x131   :  { %p367_p7 = scmp.ne.s32.totalorder %s458_s3, %s366_s17  ;;  %p370_p8 = scmp.lt.u32.totalorder %s366_s17, %s458_s3 }
 0x133   :  { %p372_p9 = pnand %p370_p8, %p367_p7 }
 0x135   :  { %375 = shalt.err (!%p372_p9)
}
 0x136   :  { %241 = dma.vmem_to_hbm [thread:$0]  %s236_s13, 256, %s458_s3, [#allocation4], %s386_s0, %s386_s0, %s387_s9  }
 0x137   :  { %380 = dma.done.wait [#allocation4], 256  }
 0x138   :  { %381 = vsyncadd [#allocation4], 4294967040 }
 0x139   :  { %245 = vsyncpa [#allocation3], 1 }
 0x13a   :  { %246 = vsyncpa [#allocation6], 1 }
 0x13b   :  { %247 = vsyncpa [#allocation4], 1 }

</bundles_post_ra>
